<compile_context>
chip_gen: v5e
topology: v5e:2x2
jax: 0.10.0
libtpu: 0.0.40
codegen_flags: <defaults>
</compile_context>

<pallas_src>
import functools

import jax
import jax.numpy as jnp
from jax.experimental import pallas as pl
from jax.experimental.pallas import tpu as pltpu


def _round_up(x, m):
    return (x + m - 1) // m * m


def _device_kind():
    try:
        return jax.devices()[0].device_kind.lower()
    except Exception:
        return ""


def _is_v7():
    kind = _device_kind()
    return ("v7" in kind) or ("7x" in kind)


def _vmem_capacity_bytes():
    # Prefer the trace-time hardware query; fall back to generation guess.
    try:
        cap = getattr(pltpu.get_tpu_info(), "vmem_capacity_bytes", None)
        if cap:
            return int(cap)
    except Exception:
        pass
    return (64 << 20) if _is_v7() else (128 << 20)   # v7x: 64 MiB, v5e/v6e: 128 MiB


def _m_axis_semantics(grid_m):
    # Only core_parallel actually splits a grid axis across v7x's 2 TensorCores.
    if grid_m >= 2 and _is_v7() and hasattr(pltpu, "CORE_PARALLEL"):
        return (pltpu.CORE_PARALLEL,)
    return ("parallel",)


def _patch_embed_kernel(x_ref, w_ref, b_ref, o_ref):
    # x_ref: (TM, Kp) activation tile (compute dtype, e.g. bf16), streamed
    # w_ref: (Kp, Ep) projection weight, VMEM-resident across the grid
    # b_ref: (1, Ep)  bias, f32, VMEM-resident
    # o_ref: (TM, Ep) output tile
    acc = jnp.dot(x_ref[...], w_ref[...], preferred_element_type=jnp.float32)
    o_ref[...] = (acc + b_ref[...]).astype(o_ref.dtype)


def patch_embed_forward(x_nchw, weight, bias, patch_size, flatten=True,
                        compute_dtype=jnp.bfloat16, out_dtype=None, tm=1024):
    """Forward pass of PatchEmbed (Conv2d stride==kernel_size + flatten).

    Args:
      x_nchw: (B, C, H, W) input image, NCHW like PyTorch.
      weight: (E, C, ph, pw) Conv2d weight.
      bias:   (E,) Conv2d bias.
      patch_size: (ph, pw).
      flatten: flatten spatial dims as in the module.
      compute_dtype: MXU operand dtype (default bf16; accumulation + bias add
        are always f32). Pass jnp.float32 for exact f32 math.
      out_dtype: output dtype (None -> input dtype; bf16 halves writeback).
      tm: target rows-per-tile; rounded to 256 (MXU-aligned on v6e/v7x,
        multiple of 128 for v5e).

    Returns:
      (x, H_out, W_out); x is (B, N, E) when flatten=True else (B, E, Hp, Wp).
    """
    B, C, H, W = x_nchw.shape
    ph, pw = patch_size
    assert H % ph == 0 and W % pw == 0, "image dims must be divisible by patch size"
    E = weight.shape[0]
    Hp, Wp = H // ph, W // pw
    N = Hp * Wp
    K = C * ph * pw
    M = B * N

    if compute_dtype is None:
        compute_dtype = x_nchw.dtype
    if out_dtype is None:
        out_dtype = x_nchw.dtype

    # --- glue: unfold patches; per-patch feature order is (c, i, j), matching
    # the flattened Conv2d weight layout.  The producer of this array is
    # allowed to fuse into the Pallas input DMA (allow_input_fusion below). ---
    xp = x_nchw.reshape(B, C, Hp, ph, Wp, pw)
    xp = jnp.transpose(xp, (0, 2, 4, 1, 3, 5)).reshape(M, K)

    # Conv2d weight (E, C, ph, pw) -> (K, E) matmul weight (tiny, done once).
    w_mat = weight.reshape(E, K).T

    # --- lane/sublane friendly padding and MXU-aligned row tiling ------------
    Kp = _round_up(K, 128)
    Ep = _round_up(E, 128)

    cbytes = jnp.dtype(compute_dtype).itemsize
    obytes = jnp.dtype(out_dtype).itemsize
    pack = max(8, 32 // cbytes)          # sublane pack: 8 (f32), 16 (bf16), 32 (i8)

    if M >= 256:
        TM = min(_round_up(tm, 256), _round_up(M, 256))   # MXU-aligned
    else:
        TM = _round_up(M, pack)                           # tiny inputs

    # VMEM working set (already includes the 2x double-buffering; no extra 2x):
    #   streamed activation + output tiles (2 buffers each) and the
    #   grid-invariant weight/bias blocks (also allocated double-buffered).
    vmem_cap = _vmem_capacity_bytes()

    def _vmem_needed(tm_):
        return (2 * tm_ * Kp * cbytes        # activation tiles
                + 2 * tm_ * Ep * obytes      # output tiles
                + 2 * Kp * Ep * cbytes       # weight (grid-invariant)
                + 2 * Ep * 4)                # bias

    while TM > 256 and _vmem_needed(TM) > int(0.70 * vmem_cap):
        TM = max(256, _round_up(TM // 2, 256))

    Mp = _round_up(M, TM)
    grid_m = pl.cdiv(Mp, TM)

    vmem_limit = int(min(max(_vmem_needed(TM) + (4 << 20), 32 << 20),
                         int(0.75 * vmem_cap)))

    xp_p = jnp.pad(xp.astype(compute_dtype), ((0, Mp - M), (0, Kp - K)))
    w_p = jnp.pad(w_mat.astype(compute_dtype), ((0, Kp - K), (0, Ep - E)))
    b_p = jnp.pad(bias.astype(jnp.float32).reshape(1, E), ((0, 0), (0, Ep - E)))

    cost = pl.CostEstimate(
        flops=2 * M * K * E,
        transcendentals=0,
        bytes_accessed=(M * K * cbytes + K * E * cbytes + E * 4
                        + M * E * obytes),
    )

    # --- hot path: tiled projection matmul + bias on the MXU ------------------
    out_flat = pl.pallas_call(
        _patch_embed_kernel,
        out_shape=jax.ShapeDtypeStruct((Mp, Ep), out_dtype),
        grid=(grid_m,),
        in_specs=[
            pl.BlockSpec((TM, Kp), lambda i: (i, 0)),   # activation tile, streamed
            pl.BlockSpec((Kp, Ep), lambda i: (0, 0)),   # weight, VMEM-resident
            pl.BlockSpec((1, Ep), lambda i: (0, 0)),    # bias, VMEM-resident
        ],
        out_specs=pl.BlockSpec((TM, Ep), lambda i: (i, 0)),
        compiler_params=pltpu.CompilerParams(
            dimension_semantics=_m_axis_semantics(grid_m),
            vmem_limit_bytes=vmem_limit,
            allow_input_fusion=[0],       # fuse unfold/cast/pad into the input DMA
        ),
        cost_estimate=cost,
    )(xp_p, w_p, b_p)

    out_flat = out_flat[:M, :E]

    if flatten:
        x_out = out_flat.reshape(B, N, E)  # == conv(x).flatten(2).transpose(1, 2)
    else:
        x_out = jnp.transpose(out_flat.reshape(B, Hp, Wp, E), (0, 3, 1, 2))

    # norm_layer=None -> nn.Identity(), so no norm applied.
    return x_out, Hp, Wp


if __name__ == "__main__":
    # Small shapes consistent with the module:
    #   img_size=16, patch_size=4, in_chans=4, embed_dim=32, batch=2
    B, C, H, W = 2, 4, 16, 16
    ph, pw = 4, 4
    E = 32

    key = jax.random.PRNGKey(0)
    kx, kw, kb = jax.random.split(key, 3)
    x = jax.random.normal(kx, (B, C, H, W), dtype=jnp.float32)
    weight = jax.random.normal(kw, (E, C, ph, pw), dtype=jnp.float32) * 0.02
    bias = jax.random.normal(kb, (E,), dtype=jnp.float32) * 0.02

    fwd = jax.jit(functools.partial(patch_embed_forward,
                                    patch_size=(ph, pw), flatten=True),
                  static_argnames=("compute_dtype", "out_dtype"))

    # Default path: bf16 operands on the MXU, f32 accumulation, f32 output.
    out_bf16, Hp, Wp = fwd(x, weight, bias)
    out_bf16 = jax.block_until_ready(out_bf16)

    # Exact f32 path (for a tight check against the conv reference).
    out_f32, _, _ = fwd(x, weight, bias, compute_dtype=jnp.float32)
    out_f32 = jax.block_until_ready(out_f32)

    # Low-precision output path (bf16 compute + bf16 writeback).
    out_lp, _, _ = fwd(x, weight, bias, out_dtype=jnp.bfloat16)
    out_lp = jax.block_until_ready(out_lp)

    # Reference: lax.conv with stride == kernel (same semantics as nn.Conv2d).
    ref = jax.lax.conv_general_dilated(
        x, weight, window_strides=(ph, pw), padding="VALID",
        dimension_numbers=("NCHW", "OIHW", "NCHW"),
    ) + bias.reshape(1, E, 1, 1)
    ref = jnp.transpose(ref.reshape(B, E, Hp * Wp), (0, 2, 1))

    assert out_f32.shape == (B, Hp * Wp, E)
    assert jnp.allclose(out_f32, ref, atol=1e-4, rtol=1e-4), "f32 mismatch"
    assert jnp.allclose(out_bf16, ref, atol=2e-2, rtol=2e-2), "bf16 mismatch"
    assert jnp.allclose(out_lp.astype(jnp.float32), ref, atol=3e-2, rtol=3e-2), \
        "bf16-out mismatch"

    print("KERNEL_OK")
</pallas_src>

<mosaic_0001>
module attributes {stable_mosaic.version = 11 : i64} {
  func.func @_patch_embed_kernel(%arg0: i32, %arg1: memref<32x128xbf16, #tpu.memory_space<vmem>>, %arg2: memref<128x128xbf16, #tpu.memory_space<vmem>>, %arg3: memref<1x128xf32, #tpu.memory_space<vmem>>, %arg4: memref<32x128xf32, #tpu.memory_space<vmem>>) attributes {dimension_semantics = [#tpu.dimension_semantics<parallel>], iteration_bounds = array<i64: 1>, scalar_prefetch = 0 : i64, scratch_operands = 0 : i64, tpu.core_type = #tpu.core_type<tc>, window_params = [{transform_indices = @transform_0, window_bounds = array<i64: 32, 128>}, {pipeline_mode = #tpu.pipeline_mode<synchronous>, transform_indices = @transform_1, window_bounds = array<i64: 128, 128>}, {pipeline_mode = #tpu.pipeline_mode<synchronous>, transform_indices = @transform_2, window_bounds = array<i64: 1, 128>}, {transform_indices = @transform_3, window_bounds = array<i64: 32, 128>}]} {
    %c0 = arith.constant 0 : index
    %c0_0 = arith.constant 0 : index
    %0 = vector.load %arg1[%c0, %c0_0] : memref<32x128xbf16, #tpu.memory_space<vmem>>, vector<32x128xbf16>
    %c0_1 = arith.constant 0 : index
    %c0_2 = arith.constant 0 : index
    %1 = vector.load %arg2[%c0_1, %c0_2] : memref<128x128xbf16, #tpu.memory_space<vmem>>, vector<128x128xbf16>
    %cst = arith.constant dense<0.000000e+00> : vector<32x128xf32>
    %2 = tpu.matmul %0, %1, %cst {dimension_numbers = #tpu.dot_dimension_numbers<[1], [0], [0], [1], [0, 0, 1, 1], [], []>} : vector<32x128xbf16>, vector<128x128xbf16>, vector<32x128xf32> -> vector<32x128xf32>
    %c0_3 = arith.constant 0 : index
    %c0_4 = arith.constant 0 : index
    %3 = vector.load %arg3[%c0_3, %c0_4] : memref<1x128xf32, #tpu.memory_space<vmem>>, vector<1x128xf32>
    %4 = vector.broadcast %3 : vector<1x128xf32> to vector<32x128xf32>
    %5 = arith.addf %2, %4 : vector<32x128xf32>
    %c0_5 = arith.constant 0 : index
    %c0_6 = arith.constant 0 : index
    %6 = vector.load %arg4[%c0_5, %c0_6] : memref<32x128xf32, #tpu.memory_space<vmem>>, vector<32x128xf32>
    tpu.vector_store %arg4[%c0_5, %c0_6], %5 {strides = array<i32>} : memref<32x128xf32, #tpu.memory_space<vmem>>, vector<32x128xf32>,
    return
  }
  func.func @transform_0(%arg0: i32) -> (i32, i32) {
    %c0_i32 = arith.constant 0 : i32
    %c0_i32_0 = arith.constant 0 : i32
    return %arg0, %c0_i32 : i32, i32
  }
  func.func @transform_1(%arg0: i32) -> (i32, i32) {
    %c0_i32 = arith.constant 0 : i32
    %c0_i32_0 = arith.constant 0 : i32
    %c0_i32_1 = arith.constant 0 : i32
    return %c0_i32, %c0_i32_0 : i32, i32
  }
  func.func @transform_2(%arg0: i32) -> (i32, i32) {
    %c0_i32 = arith.constant 0 : i32
    %c0_i32_0 = arith.constant 0 : i32
    %c0_i32_1 = arith.constant 0 : i32
    return %c0_i32, %c0_i32_0 : i32, i32
  }
  func.func @transform_3(%arg0: i32) -> (i32, i32) {
    %c0_i32 = arith.constant 0 : i32
    %c0_i32_0 = arith.constant 0 : i32
    return %arg0, %c0_i32 : i32, i32
  }
}

</mosaic_0001>

<bundles_post_ra>
// kernel: patch_embed_forward.1
= control target key start
LH: loop header
LB: loop body
LE: loop exit
PB: predicated region body
PF: predicated region fallthrough
CT: control target
= control target key end

     0   :  { %s287_s0 = inlined_call_operand.vmem [shape: bf16[32,128], index: 0, kind: input, shape index: {}]   ;;  %s288_s1 = inlined_call_operand.vmem [shape: bf16[128,128], index: 1, kind: input, shape index: {}]   ;;  %s289_s2 = inlined_call_operand.vmem [shape: f32[1,128], index: 2, kind: input, shape index: {}]   ;;  %s290_s3 = inlined_call_operand.hbm [shape: f32[32,128], index: 3, kind: output, shape index: {}]  }
   0x1   :  { %v189_v0 = vld [vmem:[%s288_s1 + $0x38] sm:$0xff]  ;;  %v188_v1 = vld [vmem:[%s288_s1 + $0x30] sm:$0xff] }
   0x2   :  { %99 = vmatpush.bf16.msra.mxu0 %v189_v0  ;;  %190 = vmatpush.bf16.msra.mxu1 %v189_v0 }
   0x3   :  { %8 = vsyncpa [#allocation3], 0  ;;  %v187_v2 = vld [vmem:[%s288_s1 + $0x28] sm:$0xff]  ;;  %v186_v3 = vld [vmem:[%s288_s1 + $0x20] sm:$0xff]  ;;  %s230_s10 = smov 8  }
   0x4   :  { %v185_v4 = vld [vmem:[%s288_s1 + $0x18] sm:$0xff]  ;;  %v184_v5 = vld [vmem:[%s288_s1 + $0x10] sm:$0xff]  ;;  %v183_v6 = vld [vmem:[%s288_s1 + $0x8] sm:$0xff] }
   0x5   :  { %v182_v7 = vld [vmem:[%s288_s1] sm:$0xff]  ;;  %v181_v9 = vld [vmem:[%s287_s0 + $0x8] sm:$0xff]  ;;  %s228_s1 = smov [#allocation2]  }
   0x6   :  { %100 = vmatpush.bf16.msra.mxu0 %v188_v1  ;;  %191 = vmatpush.bf16.msra.mxu1 %v188_v1  ;;  %v180_v8 = vld [vmem:[%s287_s0] sm:$0xff]  ;;  %s126_s7 = sshll.u32 %s228_s1, 4  ;;  %s128_s0 = sshll.u32 %s290_s3, 4  ;;  %s127_s7 = int_to_ptr.vmem [resolvable:$true] %s126_s7  ;;  %s129_s0 = int_to_ptr.hbm [resolvable:$true] %s128_s0 }
   0x7   :  { %v201_v10 = vld [vmem:[%s289_s2] ss:$0 sm:$0xff]  ;;  %s229_s2 = smov 128  }
   0xa   :  { %101 = vmatpush.bf16.msra.mxu0 %v187_v2  ;;  %192 = vmatpush.bf16.msra.mxu1 %v187_v2 }
   0xe   :  { %102 = vmatpush.bf16.msra.mxu0 %v186_v3  ;;  %193 = vmatpush.bf16.msra.mxu1 %v186_v3 }
  0x12   :  { %103 = vmatpush.bf16.msra.mxu0 %v185_v4  ;;  %194 = vmatpush.bf16.msra.mxu1 %v185_v4 }
  0x16   :  { %104 = vmatpush.bf16.msra.mxu0 %v184_v5  ;;  %195 = vmatpush.bf16.msra.mxu1 %v184_v5 }
  0x1a   :  { %105 = vmatpush.bf16.msra.mxu0 %v183_v6  ;;  %196 = vmatpush.bf16.msra.mxu1 %v183_v6 }
  0x1e   :  { %106 = vmatpush.bf16.msra.mxu0 %v182_v7  ;;  %197 = vmatpush.bf16.msra.mxu1 %v182_v7 }
  0x21   :  { %107 = vmatmul.bf16.vlgmr.msra.gmra.mxu0 %v180_v8  ;;  %112 = vmatmul.bf16.vlgmr.msra.gmra.mxu1 %v181_v9 }
  0x9e   :  { %v108_v11 = vpop.f32.mrf.mxu0  ;;  %v113_v12 = vpop.f32.mrf.mxu1 }
  0x9f   :  { %v109_v13 = vadd.f32 %v201_v10, %v108_v11  ;;  %v114_v14 = vadd.f32 %v201_v10, %v113_v12 }
  0xa1   :  { %118 = vst [vmem:[#allocation2] sm:$0xff] %v109_v13 }
  0xa2   :  { %120 = vst [vmem:[#allocation2 + $0x10] sm:$0xff] %v114_v14 }
  0xa6   :  { %v110_v15 = vpop.f32.mrf.mxu0  ;;  %v115_v16 = vpop.f32.mrf.mxu1 }
  0xa7   :  { %v111_v17 = vadd.f32 %v201_v10, %v110_v15  ;;  %v116_v18 = vadd.f32 %v201_v10, %v115_v16 }
  0xa9   :  { %119 = vst [vmem:[#allocation2 + $0x8] sm:$0xff] %v111_v17 }
  0xaa   :  { %121 = vst [vmem:[#allocation2 + $0x18] sm:$0xff] %v116_v18 }
  0xab   :  { %134 = dma.vmem_to_hbm [thread:$0]  %s127_s7, 512, %s129_s0, [#allocation3], %s229_s2, %s229_s2, %s230_s10  }
  0xac   :  { %226 = dma.done.wait [#allocation3], 512  }
  0xad   :  { %227 = vsyncadd [#allocation3], 4294966784 }
  0xae   :  { %139 = vsyncpa [#allocation3], 1 }

</bundles_post_ra>
